<compile_context>
chip_gen: v7x
topology: tpu7x:2x2x1
jax: 0.10.0
libtpu: 0.0.40
codegen_flags: <defaults>
</compile_context>

<pallas_src>
import jax
import jax.numpy as jnp
from jax.experimental import pallas as pl
from jax.experimental.pallas import tpu as pltpu


def periodicity_kernel(w_ref, xt_ref, out_ref):
    # w_ref:   SMEM (1,) holding precomputed w_t = 2*pi / p_t
    # xt_ref:  VMEM (2, TILE)  -> row 0 = x, row 1 = t   (N on the lane axis)
    # out_ref: VMEM (4, TILE)
    w_t = w_ref[0]
    w_x = jnp.float32(jnp.pi)

    x = xt_ref[0:1, :]          # (1, TILE)
    t = xt_ref[1:2, :]          # (1, TILE)

    # Direct sublane-slice stores: plain full-lane vst's, no concatenate.
    out_ref[0:1, :] = jnp.cos(w_t * t)
    out_ref[1:2, :] = jnp.sin(w_t * t)
    out_ref[2:3, :] = jnp.cos(w_x * x)
    out_ref[3:4, :] = jnp.sin(w_x * x)


def periodicity_layer(x_t: jax.Array, p_t: jax.Array, *, tile: int = 32768) -> jax.Array:
    """x_t: [N, 2] float32, p_t: [1] float32 -> [N, 4] float32."""
    n = x_t.shape[0]

    # Pad N to a multiple of 128 (lane width) and cap the tile for small inputs.
    n_pad128 = pl.cdiv(n, 128) * 128
    tile = min(pl.cdiv(tile, 128) * 128, n_pad128)
    n_pad = pl.cdiv(n, tile) * tile
    grid = (n_pad // tile,)

    # Layout plumbing outside the kernel: (N, 2) -> zero-pad rows -> (2, N_pad).
    xt_T = jnp.pad(x_t.astype(jnp.float32), ((0, n_pad - n), (0, 0))).T

    # Precompute w_t once (removes a per-grid-step scalar divide in SMEM).
    w_t = (2.0 * jnp.pi) / p_t.astype(jnp.float32).reshape((1,))

    out_T = pl.pallas_call(
        periodicity_kernel,
        out_shape=jax.ShapeDtypeStruct((4, n_pad), jnp.float32),
        grid=grid,
        in_specs=[
            pl.BlockSpec(memory_space=pltpu.SMEM),            # w_t scalar
            pl.BlockSpec((2, tile), lambda i: (0, i)),         # (2, TILE) tile of x/t
        ],
        out_specs=pl.BlockSpec((4, tile), lambda i: (0, i)),
        compiler_params=pltpu.CompilerParams(
            dimension_semantics=("parallel",),
        ),
    )(w_t, xt_T)

    # Back to the PyTorch layout, dropping the padded tail.
    return out_T.T[:n]


def periodicity_ref(x_t, p_t):
    x = x_t[:, 0]
    t = x_t[:, 1]
    w_t = 2.0 * jnp.pi / p_t[0]
    w_x = jnp.pi
    return jnp.column_stack(
        [jnp.cos(w_t * t), jnp.sin(w_t * t), jnp.cos(w_x * x), jnp.sin(w_x * x)]
    )


if __name__ == "__main__":
    key = jax.random.PRNGKey(0)
    N = 16
    x_t = jax.random.normal(key, (N, 2), dtype=jnp.float32)

    # Parameter p_t initialized deterministically to pi (matches torch init).
    p_t = jnp.array([jnp.pi], dtype=jnp.float32)

    out = periodicity_layer(x_t, p_t)
    out = jax.block_until_ready(out)

    ref = periodicity_ref(x_t, p_t)
    assert out.shape == (N, 4)
    assert jnp.allclose(out, ref, atol=1e-5, rtol=1e-5)

    print("KERNEL_OK")
</pallas_src>

<mosaic_0001>
module attributes {stable_mosaic.version = 11 : i64} {
  func.func @periodicity_kernel(%arg0: i32, %arg1: memref<1xf32, #tpu.memory_space<smem>>, %arg2: memref<2x128xf32, #tpu.memory_space<vmem>>, %arg3: memref<4x128xf32, #tpu.memory_space<vmem>>) attributes {dimension_semantics = [#tpu.dimension_semantics<parallel>], iteration_bounds = array<i64: 1>, scalar_prefetch = 0 : i64, scratch_operands = 0 : i64, tpu.core_type = #tpu.core_type<tc>, window_params = [{transform_indices = @transform_0, window_bounds = array<i64: 1>}, {transform_indices = @transform_1, window_bounds = array<i64: 2, 128>}, {transform_indices = @transform_2, window_bounds = array<i64: 4, 128>}]} {
    %c0 = arith.constant 0 : index
    %0 = memref.load %arg1[%c0] : memref<1xf32, #tpu.memory_space<smem>>
    %c0_0 = arith.constant 0 : index
    %c0_1 = arith.constant 0 : index
    %1 = vector.load %arg2[%c0_0, %c0_1] : memref<2x128xf32, #tpu.memory_space<vmem>>, vector<1x128xf32>
    %c1 = arith.constant 1 : index
    %c0_2 = arith.constant 0 : index
    %2 = vector.load %arg2[%c1, %c0_2] : memref<2x128xf32, #tpu.memory_space<vmem>>, vector<1x128xf32>
    %3 = vector.broadcast %0 : f32 to vector<1x128xf32>
    %4 = arith.mulf %3, %2 : vector<1x128xf32>
    %5 = math.cos %4 : vector<1x128xf32>
    %c0_3 = arith.constant 0 : index
    %c0_4 = arith.constant 0 : index
    %6 = vector.load %arg3[%c0_3, %c0_4] : memref<4x128xf32, #tpu.memory_space<vmem>>, vector<1x128xf32>
    tpu.vector_store %arg3[%c0_3, %c0_4], %5 {strides = array<i32>} : memref<4x128xf32, #tpu.memory_space<vmem>>, vector<1x128xf32>,
    %7 = vector.broadcast %0 : f32 to vector<1x128xf32>
    %8 = arith.mulf %7, %2 : vector<1x128xf32>
    %9 = math.sin %8 : vector<1x128xf32>
    %c1_5 = arith.constant 1 : index
    %c0_6 = arith.constant 0 : index
    %10 = vector.load %arg3[%c1_5, %c0_6] : memref<4x128xf32, #tpu.memory_space<vmem>>, vector<1x128xf32>
    tpu.vector_store %arg3[%c1_5, %c0_6], %9 {strides = array<i32>} : memref<4x128xf32, #tpu.memory_space<vmem>>, vector<1x128xf32>,
    %cst = arith.constant 3.14159274 : f32
    %11 = vector.broadcast %cst : f32 to vector<1x128xf32>
    %12 = arith.mulf %11, %1 : vector<1x128xf32>
    %13 = math.cos %12 : vector<1x128xf32>
    %c2 = arith.constant 2 : index
    %c0_7 = arith.constant 0 : index
    %14 = vector.load %arg3[%c2, %c0_7] : memref<4x128xf32, #tpu.memory_space<vmem>>, vector<1x128xf32>
    tpu.vector_store %arg3[%c2, %c0_7], %13 {strides = array<i32>} : memref<4x128xf32, #tpu.memory_space<vmem>>, vector<1x128xf32>,
    %cst_8 = arith.constant 3.14159274 : f32
    %15 = vector.broadcast %cst_8 : f32 to vector<1x128xf32>
    %16 = arith.mulf %15, %1 : vector<1x128xf32>
    %17 = math.sin %16 : vector<1x128xf32>
    %c3 = arith.constant 3 : index
    %c0_9 = arith.constant 0 : index
    %18 = vector.load %arg3[%c3, %c0_9] : memref<4x128xf32, #tpu.memory_space<vmem>>, vector<1x128xf32>
    tpu.vector_store %arg3[%c3, %c0_9], %17 {strides = array<i32>} : memref<4x128xf32, #tpu.memory_space<vmem>>, vector<1x128xf32>,
    return
  }
  func.func @transform_0(%arg0: i32) -> i32 {
    %c0_i32 = arith.constant 0 : i32
    %c0_i32_0 = arith.constant 0 : i32
    return %c0_i32 : i32
  }
  func.func @transform_1(%arg0: i32) -> (i32, i32) {
    %c0_i32 = arith.constant 0 : i32
    %c0_i32_0 = arith.constant 0 : i32
    return %c0_i32, %arg0 : i32, i32
  }
  func.func @transform_2(%arg0: i32) -> (i32, i32) {
    %c0_i32 = arith.constant 0 : i32
    %c0_i32_0 = arith.constant 0 : i32
    return %c0_i32, %arg0 : i32, i32
  }
}

</mosaic_0001>

<bundles_post_ra>
// kernel: tpu_custom_call.1
= control target key start
LH: loop header
LB: loop body
LE: loop exit
PB: predicated region body
PF: predicated region fallthrough
CT: control target
= control target key end

     0   :  { %s625_s0 = inlined_call_operand.<no memory space> [shape: f32[1], index: 0, kind: input, shape index: {}]   ;;  %s626_s1 = inlined_call_operand.vmem [shape: f32[2,128], index: 1, kind: input, shape index: {}]   ;;  %s627_s2 = inlined_call_operand.hbm [shape: f32[4,128], index: 2, kind: output, shape index: {}]  }
   0x1   :  { %v15_v0 = vld [vmem:[%s626_s1 + $0x1] sm:$0x1]  ;;  %v16_v1 = vstv %s625_s0  ;;  %v14_v3 = vld [vmem:[%s626_s1] sm:$0x1] }
   0x2   :  { %v542_v2 = vmul.f32 %v16_v1, %v15_v0 }
   0x3   :  { %8 = vsyncpa [#allocation4], 0  ;;  %v549_v6 = vmul.f32 3.1415927, %v14_v3  ;;  %v514_v24 = vmov 683565275  }
   0x4   :  { %v18_v4 = vand.u32 2147483647, %v542_v2  ;;  %v21_v5 = vand.u32 2139095040, %v542_v2  ;;  %v515_v26 = vmov 2475754826   ;;  %vm20_vm14 = vcmp.lt.s32.totalorder %v542_v2, 0 }
   0x5   :  { %v228_v9 = vand.u32 2147483647, %v549_v6  ;;  %v231_v10 = vand.u32 2139095040, %v549_v6  ;;  %v516_v28 = vmov 2131351028   ;;  %s520_s0 = smov [#allocation3]  }
   0x6   :  { %v22_v7 = vshrl.u32 %v21_v5, 23  ;;  %v25_v8 = vand.u32 8388607, %v18_v4  ;;  %v517_v30 = vmov 2102212464   ;;  %s443_s1 = sshll.u32 %s520_s0, 4  ;;  %s444_s1 = int_to_ptr.vmem [resolvable:$true] %s443_s1 }
   0x7   :  { %v232_v12 = vshrl.u32 %v231_v10, 23  ;;  %v557_v16 = vand.u32 8388607, %v228_v9  ;;  %v518_v32 = vmov 920167782   ;;  %s490_s15 = scalar_lea.vmem %s444_s1, 64  ;;  %p495_p1 = scmp.lt.s32.totalorder %s444_s1, %s444_s1 }
   0x8   :  { %v451_v11 = vadd.s32 4294967169, %v22_v7  ;;  %v26_v14 = vor.u32 8388608, %v25_v8  ;;  %v519_v39 = vmov 1326507024   ;;  %vm19_vm15 = vcmp.le.f32.partialorder %v18_v4, 0.7853982  ;;  %p491_p0 = scmp.ne.s32.totalorder %s444_s1, %s490_s15  ;;  %p496_p2 = scmp.lt.s32.totalorder %s490_s15, %s490_s15 }
   0x9   :  { %v459_v15 = vadd.s32 4294967169, %v232_v12  ;;  %v236_v22 = vor.u32 8388608, %v557_v16 }
   0xa   :  { %v28_v13 = vadd.s32 1, %v451_v11  ;;  %v559_v21 = vshll.u32 %v26_v14, 8  ;;  %p497_p3 = por %p496_p2, %p495_p1 }
   0xb   :  { %v238_v18 = vadd.s32 1, %v459_v15 }
   0xc   :  { %vm29_vm0 = vcmp.gt.s32.totalorder %v28_v13, 0  ;;  %p498_p4 = pnand %p497_p3, %p491_p0 }
   0xd   :  { %v30_v17 = vsel %vm29_vm0, %v28_v13, 0  ;;  %vm239_vm1 = vcmp.gt.s32.totalorder %v238_v18, 0  ;;  %vm230_vm0 = vcmp.lt.s32.totalorder %v549_v6, 0 }
   0xe   :  { %v31_v19 = vshrl.u32 %v30_v17, 5  ;;  %v32_v20 = vand.u32 31, %v30_v17  ;;  %v240_v44 = vsel %vm239_vm1, %v238_v18, 0  ;;  %vm229_vm1 = vcmp.le.f32.partialorder %v228_v9, 0.7853982 }
   0xf   :  { %v241_v47 = vshrl.u32 %v240_v44, 5  ;;  %v242_v48 = vand.u32 31, %v240_v44 }
  0x10   :  { %v33_v23 = vsub.s32 32, %v32_v20  ;;  %v35_v25 = vshll.u32 %v514_v24, %v32_v20  ;;  %v38_v27 = vshll.u32 %v515_v26, %v32_v20  ;;  %v41_v29 = vshll.u32 %v516_v28, %v32_v20 }
  0x11   :  { %v44_v31 = vshll.u32 %v517_v30, %v32_v20  ;;  %v47_v33 = vshll.u32 %v518_v32, %v32_v20  ;;  %vm50_vm2 = vcmp.lt.s32.totalorder %v31_v19, 1  ;;  %vm51_vm3 = vcmp.lt.s32.totalorder %v31_v19, 2 }
  0x12   :  { %v34_v34 = vshrl.u32 %v514_v24, %v33_v23  ;;  %v36_v35 = vshrl.u32 %v515_v26, %v33_v23  ;;  %v39_v36 = vshrl.u32 %v516_v28, %v33_v23  ;;  %v42_v37 = vshrl.u32 %v517_v30, %v33_v23 }
  0x13   :  { %v45_v38 = vshrl.u32 %v518_v32, %v33_v23  ;;  %v48_v40 = vshrl.u32 %v519_v39, %v33_v23  ;;  %vm52_vm4 = vcmp.lt.s32.totalorder %v31_v19, 3  ;;  %vm53_vm5 = vcmp.lt.s32.totalorder %v31_v19, 4 }
  0x14   :  { %v37_v41 = vor.u32 %v36_v35, %v35_v25  ;;  %v40_v42 = vor.u32 %v39_v36, %v38_v27  ;;  %v43_v43 = vor.u32 %v42_v37, %v41_v29  ;;  %v243_v56 = vsub.s32 32, %v242_v48 }
  0x15   :  { %v46_v45 = vor.u32 %v45_v38, %v44_v31  ;;  %v49_v46 = vor.u32 %v48_v40, %v47_v33  ;;  %v245_v60 = vshll.u32 %v514_v24, %v242_v48  ;;  %v248_v10 = vshll.u32 %v515_v26, %v242_v48 }
  0x16   :  { %v54_v49 = vsel %vm50_vm2, %v34_v34, %v37_v41  ;;  %v55_v50 = vsel %vm53_vm5, %v43_v43, 2102212464  ;;  %v58_v51 = vsel %vm50_vm2, %v37_v41, %v40_v42  ;;  %v62_v52 = vsel %vm50_vm2, %v40_v42, %v43_v43 }
  0x17   :  { %v56_v53 = vsel %vm52_vm4, %v40_v42, %v55_v50  ;;  %v59_v54 = vsel %vm53_vm5, %v46_v45, 920167782  ;;  %v63_v55 = vsel %vm53_vm5, %v49_v46, 1326507024  ;;  %v244_v0 = vshrl.u32 %v514_v24, %v243_v56 }
  0x18   :  { %v57_v57 = vsel %vm51_vm3, %v54_v49, %v56_v53  ;;  %v60_v58 = vsel %vm52_vm4, %v43_v43, %v59_v54  ;;  %v64_v59 = vsel %vm52_vm4, %v46_v45, %v63_v55  ;;  %v246_v8 = vshrl.u32 %v515_v26, %v243_v56 }
  0x19   :  { %v61_v61 = vsel %vm51_vm3, %v58_v51, %v60_v58  ;;  %v65_v62 = vsel %vm51_vm3, %v62_v52, %v64_v59  ;;  %v73_v63 = vmul.u32 %v559_v21, %v57_v57  ;;  %v249_v11 = vshrl.u32 %v516_v28, %v243_v56 }
  0x1a   :  { %v574_v1 = vmul.u32.u64.low %v559_v21, %v65_v62  ;;  %v575_v3 = vmul.u32.u64.high %v559_v21, %v65_v62, %v574_v1  ;;  %v578_v5 = vmul.u32.u64.low %v559_v21, %v61_v61  ;;  %v579_v7 = vmul.u32.u64.high %v559_v21, %v61_v61, %v578_v5 }
  0x1b   :  { %v251_v12 = vshll.u32 %v516_v28, %v242_v48  ;;  %v252_v13 = vshrl.u32 %v517_v30, %v243_v56  ;;  %v254_v14 = vshll.u32 %v517_v30, %v242_v48  ;;  %v255_v15 = vshrl.u32 %v518_v32, %v243_v56 }
  0x1c   :  { %v257_v17 = vshll.u32 %v518_v32, %v242_v48  ;;  %v247_v18 = vor.u32 %v246_v8, %v245_v60  ;;  %v250_v19 = vor.u32 %v249_v11, %v248_v10  ;;  %v258_v20 = vshrl.u32 %v519_v39, %v243_v56 }
  0x1d   :  { %vm260_vm6 = vcmp.lt.s32.totalorder %v241_v47, 1  ;;  %vm75_vm7 = vc.u32 %v575_v3, %v578_v5  ;;  %v76_v23 = vadd.s32 1, %v579_v7  ;;  %v253_v24 = vor.u32 %v252_v13, %v251_v12 }
  0x1e   :  { %v276_v21 = vshll.u32 %v236_v22, 8  ;;  %v256_v25 = vor.u32 %v255_v15, %v254_v14  ;;  %v259_v26 = vor.u32 %v258_v20, %v257_v17  ;;  %vm261_vm8 = vcmp.lt.s32.totalorder %v241_v47, 2 }
  0x1f   :  { %vm262_vm9 = vcmp.lt.s32.totalorder %v241_v47, 3  ;;  %v77_v27 = vsel %vm75_vm7, %v76_v23, %v579_v7  ;;  %vm263_vm10 = vcmp.lt.s32.totalorder %v241_v47, 4  ;;  %v264_v28 = vsel %vm260_vm6, %v244_v0, %v247_v18 }
  0x20   :  { %v268_v29 = vsel %vm260_vm6, %v247_v18, %v250_v19  ;;  %v78_v30 = vadd.s32 %v77_v27, %v73_v63  ;;  %v265_v31 = vsel %vm263_vm10, %v253_v24, 2102212464  ;;  %v269_v32 = vsel %vm263_vm10, %v256_v25, 920167782 }
  0x21   :  { %v272_v33 = vsel %vm260_vm6, %v250_v19, %v253_v24  ;;  %v266_v34 = vsel %vm262_vm9, %v250_v19, %v265_v31  ;;  %v270_v35 = vsel %vm262_vm9, %v253_v24, %v269_v32  ;;  %v273_v16 = vsel %vm263_vm10, %v259_v26, 1326507024 }
  0x22   :  { %v79_v22 = vadd.s32 536870912, %v78_v30  ;;  %v271_v36 = vsel %vm261_vm8, %v268_v29, %v270_v35  ;;  %v274_v37 = vsel %vm262_vm9, %v256_v25, %v273_v16  ;;  %v267_v38 = vsel %vm261_vm8, %v264_v28, %v266_v34 }
  0x23   :  { %v275_v39 = vsel %vm261_vm8, %v272_v33, %v274_v37  ;;  %v592_v40 = vmul.u32.u64.low %v276_v21, %v271_v36  ;;  %v593_v41 = vmul.u32.u64.high %v276_v21, %v271_v36, %v592_v40  ;;  %v283_v46 = vmul.u32 %v276_v21, %v267_v38 }
  0x24   :  { %v80_v42 = vshrl.u32 %v79_v22, 30  ;;  %v595_v43 = vmul.u32.u64.low %v276_v21, %v275_v39  ;;  %v596_v44 = vmul.u32.u64.high %v276_v21, %v275_v39, %v595_v43  ;;  %v74_v58 = vadd.s32 %v578_v5, %v575_v3 }
  0x25   :  { %v286_v48 = vadd.s32 1, %v593_v41  ;;  %vm110_vm8 = vweird.f32 %v542_v2 }
  0x26   :  { %v81_v45 = vshll.u32 %v80_v42, 30  ;;  %vm285_vm11 = vc.u32 %v596_v44, %v592_v40  ;;  %v104_v18 = vsub.s32 4, %v80_v42  ;;  %v284_v3 = vadd.s32 %v592_v40, %v596_v44 }
  0x27   :  { %v287_v50 = vsel %vm285_vm11, %v286_v48, %v593_v41 }
  0x28   :  { %v82_v49 = vsub.s32 %v78_v30, %v81_v45  ;;  %v288_v52 = vadd.s32 %v287_v50, %v283_v46  ;;  %v105_v25 = vsel %vm20_vm14, %v104_v18, %v80_v42 }
  0x29   :  { %v107_v30 = vsel %vm19_vm15, 0, %v105_v25 }
  0x2a   :  { %v84_v51 = vsub.s32 0, %v82_v49  ;;  %v289_v53 = vadd.s32 536870912, %v288_v52  ;;  %v215_v35 = vadd.s32 3, %v107_v30  ;;  %v111_v37 = vand.u32 3, %v107_v30 }
  0x2c   :  { %v452_v47 = vmin.u32 %v84_v51, %v82_v49  ;;  %v290_v55 = vshrl.u32 %v289_v53, 30  ;;  %v216_v4 = vand.u32 3, %v215_v35  ;;  %vm116_vm2 = vcmp.eq.s32.totalorder %v111_v37, 2 }
  0x2d   :  { %vm113_vm4 = vcmp.eq.s32.totalorder %v111_v37, 0  ;;  %vm112_vm6 = vcmp.lt.s32.totalorder %v111_v37, 2 }
  0x2e   :  { %v86_v54 = vclz %v452_v47  ;;  %v291_v57 = vshll.u32 %v290_v55, 30  ;;  %v314_v22 = vsub.s32 4, %v290_v55  ;;  %vm221_vm3 = vcmp.eq.s32.totalorder %v216_v4, 2 }
  0x2f   :  { %vm218_vm5 = vcmp.eq.s32.totalorder %v216_v4, 0  ;;  %vm217_vm7 = vcmp.lt.s32.totalorder %v216_v4, 2 }
  0x30   :  { %v453_v56 = vadd.s32 4294967294, %v86_v54  ;;  %v292_v60 = vsub.s32 %v288_v52, %v291_v57  ;;  %v315_v39 = vsel %vm230_vm0, %v314_v22, %v290_v55 }
  0x31   :  { %v317_v43 = vsel %vm229_vm1, 0, %v315_v39 }
  0x32   :  { %vm454_vm12 = vcmp.lt.s32.totalorder %v453_v56, 0  ;;  %v294_v0 = vsub.s32 0, %v292_v60  ;;  %v321_v55 = vand.u32 3, %v317_v43 }
  0x33   :  { %v89_v59 = vsel %vm454_vm12, 0, %v453_v56 }
  0x34   :  { %v90_v61 = vsub.s32 32, %v89_v59  ;;  %v91_v62 = vshll.u32 %v82_v49, %v89_v59  ;;  %v94_v63 = vsub.s32 4294967266, %v89_v59  ;;  %v460_v8 = vmin.u32 %v294_v0, %v292_v60 }
  0x35   :  { %v425_v49 = vadd.s32 3, %v317_v43  ;;  %vm326_vm9 = vcmp.eq.s32.totalorder %v321_v55, 2  ;;  %vm323_vm11 = vcmp.eq.s32.totalorder %v321_v55, 0 }
  0x36   :  { %v92_v1 = vshrl.u32 %v74_v58, %v90_v61  ;;  %v95_v7 = vadd.s32 127, %v94_v63  ;;  %v296_v12 = vclz %v460_v8 }
  0x37   :  { %v426_v56 = vand.u32 3, %v425_v49 }
  0x38   :  { %v93_v10 = vor.u32 %v92_v1, %v91_v62  ;;  %v96_v11 = vshll.u32 %v95_v7, 23  ;;  %v461_v15 = vadd.s32 4294967294, %v296_v12 }
  0x39   :  { %vm431_vm10 = vcmp.eq.s32.totalorder %v426_v56, 2  ;;  %vm428_vm12 = vcmp.eq.s32.totalorder %v426_v56, 0 }
  0x3a   :  { %v97_v13 = vor.u32 4788187, %v96_v11  ;;  %v100_v14 = vcvt.s32.f32 %v93_v10  ;;  %vm462_vm13 = vcmp.lt.s32.totalorder %v461_v15, 0 }
  0x3b   :  { %v299_v19 = vsel %vm462_vm13, 0, %v461_v15  ;;  %vm322_vm13 = vcmp.lt.s32.totalorder %v321_v55, 2 }
  0x3c   :  { %v98_v17 = vand.u32 2147483647, %v97_v13  ;;  %v300_v20 = vsub.s32 32, %v299_v19  ;;  %v301_v23 = vshll.u32 %v292_v60, %v299_v19  ;;  %v304_v24 = vsub.s32 4294967266, %v299_v19 }
  0x3e   :  { %v101_v5 = vmul.f32 %v100_v14, %v98_v17  ;;  %v302_v26 = vshrl.u32 %v284_v3, %v300_v20  ;;  %v305_v27 = vadd.s32 127, %v304_v24 }
  0x40   :  { %v102_v21 = vxor.u32 2147483648, %v101_v5  ;;  %v303_v31 = vor.u32 %v302_v26, %v301_v23  ;;  %v306_v32 = vshll.u32 %v305_v27, 23 }
  0x42   :  { %v103_v28 = vsel %vm20_vm14, %v102_v21, %v101_v5  ;;  %v307_v33 = vor.u32 4788187, %v306_v32  ;;  %v310_v34 = vcvt.s32.f32 %v303_v31  ;;  %vm427_vm14 = vcmp.lt.s32.totalorder %v426_v56, 2 }
  0x43   :  { %v106_v29 = vsel %vm19_vm15, %v542_v2, %v103_v28  ;;  %vm320_vm15 = vweird.f32 %v549_v6 }
  0x44   :  { %482 = vcosq.f32 %v106_v29  ;;  %v308_v16 = vand.u32 2147483647, %v307_v33 }
  0x45   :  { %484 = vsinq.f32 %v106_v29 }
  0x46   :  { %v311_v36 = vmul.f32 %v310_v34, %v308_v16 }
  0x48   :  { %v312_v38 = vxor.u32 2147483648, %v311_v36 }
  0x4a   :  { %v313_v40 = vsel %vm230_vm0, %v312_v38, %v311_v36 }
  0x4b   :  { %v316_v42 = vsel %vm229_vm1, %v549_v6, %v313_v40 }
  0x4c   :  { %486 = vcosq.f32 %v316_v42 }
  0x4d   :  { %488 = vsinq.f32 %v316_v42 }
  0x4e   :  { %v483_v41 = vpop.eup %482 }
  0x4f   :  { %v485_v44 = vpop.eup %484  ;;  %v117_v45 = vxor.u32 2147483648, %v483_v41 }
  0x50   :  { %v114_v46 = vxor.u32 2147483648, %v485_v44 }
  0x51   :  { %v118_v9 = vsel %vm116_vm2, %v117_v45, %v485_v44  ;;  %v223_v48 = vsel %vm221_vm3, %v117_v45, %v485_v44 }
  0x52   :  { %v115_v50 = vsel %vm113_vm4, %v483_v41, %v114_v46  ;;  %v220_v51 = vsel %vm218_vm5, %v483_v41, %v114_v46 }
  0x53   :  { %v119_v52 = vsel %vm112_vm6, %v115_v50, %v118_v9  ;;  %v224_v47 = vsel %vm217_vm7, %v220_v51, %v223_v48 }
  0x54   :  { %v120_v53 = vsel %vm110_vm8, nan, %v119_v52  ;;  %v225_v54 = vsel %vm110_vm8, nan, %v224_v47 }
  0x55   :  { %121 = vst [vmem:[#allocation3] sm:$0x1] %v120_v53  ;;  %226 = vst [vmem:[#allocation3 + $0x1] sm:$0x1] %v225_v54 }
  0x56   :  { %v487_v57 = vpop.eup %486 }
  0x57   :  { %v489_v58 = vpop.eup %488  ;;  %v327_v59 = vxor.u32 2147483648, %v487_v57 }
  0x58   :  { %v324_v2 = vxor.u32 2147483648, %v489_v58 }
  0x59   :  { %v328_v60 = vsel %vm326_vm9, %v327_v59, %v489_v58  ;;  %v433_v61 = vsel %vm431_vm10, %v327_v59, %v489_v58 }
  0x5a   :  { %v325_v62 = vsel %vm323_vm11, %v487_v57, %v324_v2  ;;  %v430_v63 = vsel %vm428_vm12, %v487_v57, %v324_v2 }
  0x5b   :  { %v329_v0 = vsel %vm322_vm13, %v325_v62, %v328_v60  ;;  %v434_v1 = vsel %vm427_vm14, %v430_v63, %v433_v61 }
  0x5c   :  { %v330_v7 = vsel %vm320_vm15, nan, %v329_v0  ;;  %v435_v8 = vsel %vm320_vm15, nan, %v434_v1 }
  0x5d   :  { %331 = vst [vmem:[#allocation3 + $0x2] sm:$0x1] %v330_v7  ;;  %436 = vst [vmem:[#allocation3 + $0x3] sm:$0x1] %v435_v8 }
  0x5e   :  { %501 = shalt.err (!%p498_p4)
}
  0x5f   :  { %s502_s18 = scalar_lea.hbm %s627_s2, 64 }
  0x60   :  { %p503_p5 = scmp.ne.s32.totalorder %s627_s2, %s502_s18  ;;  %p506_p6 = scmp.lt.u32.totalorder %s502_s18, %s627_s2 }
  0x62   :  { %p508_p7 = pnand %p506_p6, %p503_p5 }
  0x64   :  { %511 = shalt.err (!%p508_p7)
}
  0x65   :  { %446 = dma.vmem_to_hbm [thread:$0]  %s444_s1, 64, %s627_s2, [#allocation4]  }
  0x66   :  { %512 = dma.done.wait [#allocation4], 64  }
  0x67   :  { %513 = vsyncadd [#allocation4], 4294967232 }
  0x68   :  { %450 = vsyncpa [#allocation4], 1 }

</bundles_post_ra>
